<compile_context>
chip_gen: v7x
topology: tpu7x:2x2x1
jax: 0.10.0
libtpu: 0.0.40
codegen_flags: <defaults>
</compile_context>

<pallas_src>
import functools

import jax
import jax.numpy as jnp
from jax.experimental import pallas as pl
from jax.experimental.pallas import tpu as pltpu


def _round_up(n, m):
    return ((n + m - 1) // m) * m


def _sigmoid(x):
    # sigmoid(x) == 0.5 * tanh(0.5 * x) + 0.5 : one EUP push instead of exp + divide.
    return 0.5 * jnp.tanh(0.5 * x) + 0.5


def _dnn_kernel(x_ref,
                w1_ref, b1_ref,
                w2_ref, b2_ref,
                w3_ref, b3_ref,
                w4_ref, b4_ref,
                w5_ref, b5_ref,
                out_ref):
    """Fused MLP forward for one batch tile (all weights resident in VMEM)."""
    compute_dtype = w1_ref.dtype  # f32 or bf16 (MXU input dtype)

    h = x_ref[...]
    # Layers 1-4: Linear (f32 accumulate) + bias + Sigmoid, all fused.
    for w_ref, b_ref in ((w1_ref, b1_ref), (w2_ref, b2_ref),
                         (w3_ref, b3_ref), (w4_ref, b4_ref)):
        z = jnp.dot(h, w_ref[...], preferred_element_type=jnp.float32) + b_ref[...]
        h = _sigmoid(z).astype(compute_dtype)

    # Layer 5: Linear only (logits).
    out = jnp.dot(h, w5_ref[...], preferred_element_type=jnp.float32) + b5_ref[...]
    out_ref[...] = out.astype(out_ref.dtype)


@functools.partial(jax.jit, static_argnames=("batch_tile", "compute_dtype"))
def dnn_forward(x, params, batch_tile=256, compute_dtype=jnp.float32):
    """DNNModel.forward via a single fused Pallas kernel.

    x: [B, input_dim] float32
    params: (w1, b1, ..., w5, b5) with w_i: [in, out] f32, b_i: [1, out] f32
    """
    B, D = x.shape
    w1, b1, w2, b2, w3, b3, w4, b4, w5, b5 = params
    H = w1.shape[1]
    C = w5.shape[1]

    # Lane-dense padded widths (multiples of 128).
    Dp = _round_up(D, 128)
    Hp = _round_up(H, 128)
    Cp = _round_up(C, 128)

    def pad2(a, rows, cols):
        return jnp.pad(a, ((0, rows - a.shape[0]), (0, cols - a.shape[1])))

    # Weights cast to the MXU compute dtype in the wrapper (halves weight/x HBM
    # traffic when bf16); biases stay f32 (bias-add + sigmoid are done in f32).
    w1p = pad2(w1, Dp, Hp).astype(compute_dtype)
    w2p = pad2(w2, Hp, Hp).astype(compute_dtype)
    w3p = pad2(w3, Hp, Hp).astype(compute_dtype)
    w4p = pad2(w4, Hp, Hp).astype(compute_dtype)
    w5p = pad2(w5, Hp, Cp).astype(compute_dtype)
    b1p = pad2(b1, 1, Hp)
    b2p = pad2(b2, 1, Hp)
    b3p = pad2(b3, 1, Hp)
    b4p = pad2(b4, 1, Hp)
    b5p = pad2(b5, 1, Cp)
    padded_params = (w1p, b1p, w2p, b2p, w3p, b3p, w4p, b4p, w5p, b5p)

    # Batch tiling: clamp the tile to the (8-rounded) batch so tiny batches don't
    # get padded to 256 rows, and pad the batch to a multiple of the tile.
    tile = min(int(batch_tile), _round_up(B, 8))
    Bp = _round_up(B, tile)
    xp = jnp.pad(x, ((0, Bp - B), (0, Dp - D))).astype(compute_dtype)

    # Trace-time VMEM budget check for the resident-weight design
    # (v7x: 64 MiB physical / 32 MiB default scoped limit).
    itemsize = jnp.dtype(compute_dtype).itemsize
    weight_bytes = sum(int(p.size) * p.dtype.itemsize for p in padded_params)
    stream_bytes = 2 * tile * Dp * itemsize + 2 * tile * Cp * 4  # dbl-buffered x / out
    act_bytes = 3 * tile * Hp * 4                                # in-flight activations
    assert weight_bytes + stream_bytes + act_bytes < 24 * 1024 * 1024, (
        "resident-weight MLP exceeds safe VMEM budget; tile the hidden dim instead")

    grid = (Bp // tile,)

    def full_block(a):
        # Constant-index full-array block -> stays resident in VMEM across the grid.
        return pl.BlockSpec(a.shape, lambda i: (0,) * a.ndim)

    in_specs = [pl.BlockSpec((tile, Dp), lambda i: (i, 0))]
    in_specs += [full_block(p) for p in padded_params]
    out_specs = pl.BlockSpec((tile, Cp), lambda i: (i, 0))

    out_padded = pl.pallas_call(
        _dnn_kernel,
        out_shape=jax.ShapeDtypeStruct((Bp, Cp), jnp.float32),
        grid_spec=pltpu.PrefetchScalarGridSpec(
            num_scalar_prefetch=0,
            grid=grid,
            in_specs=in_specs,
            out_specs=out_specs,
        ),
        compiler_params=pltpu.CompilerParams(
            dimension_semantics=("parallel",)),
    )(xp, *padded_params)

    return out_padded[:B, :C]


def init_params(key, input_dim, hidden_dim, num_classes):
    """Deterministic init mimicking nn.Linear's U(-1/sqrt(fan_in), 1/sqrt(fan_in))."""
    dims = [(input_dim, hidden_dim),
            (hidden_dim, hidden_dim),
            (hidden_dim, hidden_dim),
            (hidden_dim, hidden_dim),
            (hidden_dim, num_classes)]
    params = []
    for (fan_in, fan_out) in dims:
        key, kw, kb = jax.random.split(key, 3)
        bound = 1.0 / jnp.sqrt(jnp.float32(fan_in))
        w = jax.random.uniform(kw, (fan_in, fan_out), jnp.float32, -bound, bound)
        b = jax.random.uniform(kb, (1, fan_out), jnp.float32, -bound, bound)
        params += [w, b]
    return tuple(params)


def dnn_forward_ref(x, params):
    """Pure-JAX reference of the PyTorch forward."""
    w1, b1, w2, b2, w3, b3, w4, b4, w5, b5 = params
    h = jax.nn.sigmoid(x @ w1 + b1)
    h = jax.nn.sigmoid(h @ w2 + b2)
    h = jax.nn.sigmoid(h @ w3 + b3)
    h = jax.nn.sigmoid(h @ w4 + b4)
    return h @ w5 + b5


if __name__ == "__main__":
    key = jax.random.PRNGKey(0)
    input_dim, hidden_dim, num_classes = 16, 32, 8
    params = init_params(key, input_dim, hidden_dim, num_classes)

    # Case 1: small batch, f32 (exact module semantics), single grid step.
    key, kx = jax.random.split(key)
    x_small = jax.random.normal(kx, (8, input_dim), jnp.float32)
    out_small = jax.block_until_ready(dnn_forward(x_small, params))
    ref_small = dnn_forward_ref(x_small, params)
    assert out_small.shape == (8, num_classes)
    assert jnp.allclose(out_small, ref_small, atol=1e-5, rtol=1e-5), "f32 small mismatch"

    # Case 2: larger (non-multiple) batch, f32 — exercises batch padding and a
    # multi-step parallel grid (2 TensorCores on v7x).
    key, kx = jax.random.split(key)
    x_big = jax.random.normal(kx, (500, input_dim), jnp.float32)
    out_big = jax.block_until_ready(dnn_forward(x_big, params, batch_tile=256))
    ref_big = dnn_forward_ref(x_big, params)
    assert out_big.shape == (500, num_classes)
    assert jnp.allclose(out_big, ref_big, atol=1e-5, rtol=1e-5), "f32 big mismatch"

    # Case 3: bf16 compute path (halved HBM traffic on v6e/v7x), f32 accumulate.
    out_bf16 = jax.block_until_ready(
        dnn_forward(x_big, params, batch_tile=256, compute_dtype=jnp.bfloat16))
    assert out_bf16.shape == (500, num_classes)
    assert jnp.allclose(out_bf16, ref_big, atol=0.25, rtol=0.05), "bf16 mismatch"

    print("KERNEL_OK")
</pallas_src>

<mosaic_0001>
module attributes {stable_mosaic.version = 11 : i64} {
  func.func @_dnn_kernel(%arg0: i32, %arg1: memref<8x128xf32, #tpu.memory_space<vmem>>, %arg2: memref<128x128xf32, #tpu.memory_space<vmem>>, %arg3: memref<1x128xf32, #tpu.memory_space<vmem>>, %arg4: memref<128x128xf32, #tpu.memory_space<vmem>>, %arg5: memref<1x128xf32, #tpu.memory_space<vmem>>, %arg6: memref<128x128xf32, #tpu.memory_space<vmem>>, %arg7: memref<1x128xf32, #tpu.memory_space<vmem>>, %arg8: memref<128x128xf32, #tpu.memory_space<vmem>>, %arg9: memref<1x128xf32, #tpu.memory_space<vmem>>, %arg10: memref<128x128xf32, #tpu.memory_space<vmem>>, %arg11: memref<1x128xf32, #tpu.memory_space<vmem>>, %arg12: memref<8x128xf32, #tpu.memory_space<vmem>>) attributes {dimension_semantics = [#tpu.dimension_semantics<parallel>], iteration_bounds = array<i64: 1>, scalar_prefetch = 0 : i64, scratch_operands = 0 : i64, tpu.core_type = #tpu.core_type<tc>, window_params = [{transform_indices = @transform_0, window_bounds = array<i64: 8, 128>}, {pipeline_mode = #tpu.pipeline_mode<synchronous>, transform_indices = @transform_1, window_bounds = array<i64: 128, 128>}, {pipeline_mode = #tpu.pipeline_mode<synchronous>, transform_indices = @transform_2, window_bounds = array<i64: 1, 128>}, {pipeline_mode = #tpu.pipeline_mode<synchronous>, transform_indices = @transform_3, window_bounds = array<i64: 128, 128>}, {pipeline_mode = #tpu.pipeline_mode<synchronous>, transform_indices = @transform_4, window_bounds = array<i64: 1, 128>}, {pipeline_mode = #tpu.pipeline_mode<synchronous>, transform_indices = @transform_5, window_bounds = array<i64: 128, 128>}, {pipeline_mode = #tpu.pipeline_mode<synchronous>, transform_indices = @transform_6, window_bounds = array<i64: 1, 128>}, {pipeline_mode = #tpu.pipeline_mode<synchronous>, transform_indices = @transform_7, window_bounds = array<i64: 128, 128>}, {pipeline_mode = #tpu.pipeline_mode<synchronous>, transform_indices = @transform_8, window_bounds = array<i64: 1, 128>}, {pipeline_mode = #tpu.pipeline_mode<synchronous>, transform_indices = @transform_9, window_bounds = array<i64: 128, 128>}, {pipeline_mode = #tpu.pipeline_mode<synchronous>, transform_indices = @transform_10, window_bounds = array<i64: 1, 128>}, {transform_indices = @transform_11, window_bounds = array<i64: 8, 128>}]} {
    %c0 = arith.constant 0 : index
    %c0_0 = arith.constant 0 : index
    %0 = vector.load %arg1[%c0, %c0_0] : memref<8x128xf32, #tpu.memory_space<vmem>>, vector<8x128xf32>
    %c0_1 = arith.constant 0 : index
    %c0_2 = arith.constant 0 : index
    %1 = vector.load %arg2[%c0_1, %c0_2] : memref<128x128xf32, #tpu.memory_space<vmem>>, vector<128x128xf32>
    %cst = arith.constant dense<0.000000e+00> : vector<8x128xf32>
    %2 = tpu.matmul %0, %1, %cst {dimension_numbers = #tpu.dot_dimension_numbers<[1], [0], [0], [1], [0, 0, 1, 1], [], []>} : vector<8x128xf32>, vector<128x128xf32>, vector<8x128xf32> -> vector<8x128xf32>
    %c0_3 = arith.constant 0 : index
    %c0_4 = arith.constant 0 : index
    %3 = vector.load %arg3[%c0_3, %c0_4] : memref<1x128xf32, #tpu.memory_space<vmem>>, vector<1x128xf32>
    %4 = vector.broadcast %3 : vector<1x128xf32> to vector<8x128xf32>
    %5 = arith.addf %2, %4 : vector<8x128xf32>
    %cst_5 = arith.constant 5.000000e-01 : f32
    %6 = vector.broadcast %cst_5 : f32 to vector<8x128xf32>
    %7 = arith.mulf %6, %5 : vector<8x128xf32>
    %8 = math.tanh %7 : vector<8x128xf32>
    %cst_6 = arith.constant 5.000000e-01 : f32
    %9 = vector.broadcast %cst_6 : f32 to vector<8x128xf32>
    %10 = arith.mulf %9, %8 : vector<8x128xf32>
    %cst_7 = arith.constant 5.000000e-01 : f32
    %11 = vector.broadcast %cst_7 : f32 to vector<8x128xf32>
    %12 = arith.addf %10, %11 : vector<8x128xf32>
    %c0_8 = arith.constant 0 : index
    %c0_9 = arith.constant 0 : index
    %13 = vector.load %arg4[%c0_8, %c0_9] : memref<128x128xf32, #tpu.memory_space<vmem>>, vector<128x128xf32>
    %cst_10 = arith.constant dense<0.000000e+00> : vector<8x128xf32>
    %14 = tpu.matmul %12, %13, %cst_10 {dimension_numbers = #tpu.dot_dimension_numbers<[1], [0], [0], [1], [0, 0, 1, 1], [], []>} : vector<8x128xf32>, vector<128x128xf32>, vector<8x128xf32> -> vector<8x128xf32>
    %c0_11 = arith.constant 0 : index
    %c0_12 = arith.constant 0 : index
    %15 = vector.load %arg5[%c0_11, %c0_12] : memref<1x128xf32, #tpu.memory_space<vmem>>, vector<1x128xf32>
    %16 = vector.broadcast %15 : vector<1x128xf32> to vector<8x128xf32>
    %17 = arith.addf %14, %16 : vector<8x128xf32>
    %cst_13 = arith.constant 5.000000e-01 : f32
    %18 = vector.broadcast %cst_13 : f32 to vector<8x128xf32>
    %19 = arith.mulf %18, %17 : vector<8x128xf32>
    %20 = math.tanh %19 : vector<8x128xf32>
    %cst_14 = arith.constant 5.000000e-01 : f32
    %21 = vector.broadcast %cst_14 : f32 to vector<8x128xf32>
    %22 = arith.mulf %21, %20 : vector<8x128xf32>
    %cst_15 = arith.constant 5.000000e-01 : f32
    %23 = vector.broadcast %cst_15 : f32 to vector<8x128xf32>
    %24 = arith.addf %22, %23 : vector<8x128xf32>
    %c0_16 = arith.constant 0 : index
    %c0_17 = arith.constant 0 : index
    %25 = vector.load %arg6[%c0_16, %c0_17] : memref<128x128xf32, #tpu.memory_space<vmem>>, vector<128x128xf32>
    %cst_18 = arith.constant dense<0.000000e+00> : vector<8x128xf32>
    %26 = tpu.matmul %24, %25, %cst_18 {dimension_numbers = #tpu.dot_dimension_numbers<[1], [0], [0], [1], [0, 0, 1, 1], [], []>} : vector<8x128xf32>, vector<128x128xf32>, vector<8x128xf32> -> vector<8x128xf32>
    %c0_19 = arith.constant 0 : index
    %c0_20 = arith.constant 0 : index
    %27 = vector.load %arg7[%c0_19, %c0_20] : memref<1x128xf32, #tpu.memory_space<vmem>>, vector<1x128xf32>
    %28 = vector.broadcast %27 : vector<1x128xf32> to vector<8x128xf32>
    %29 = arith.addf %26, %28 : vector<8x128xf32>
    %cst_21 = arith.constant 5.000000e-01 : f32
    %30 = vector.broadcast %cst_21 : f32 to vector<8x128xf32>
    %31 = arith.mulf %30, %29 : vector<8x128xf32>
    %32 = math.tanh %31 : vector<8x128xf32>
    %cst_22 = arith.constant 5.000000e-01 : f32
    %33 = vector.broadcast %cst_22 : f32 to vector<8x128xf32>
    %34 = arith.mulf %33, %32 : vector<8x128xf32>
    %cst_23 = arith.constant 5.000000e-01 : f32
    %35 = vector.broadcast %cst_23 : f32 to vector<8x128xf32>
    %36 = arith.addf %34, %35 : vector<8x128xf32>
    %c0_24 = arith.constant 0 : index
    %c0_25 = arith.constant 0 : index
    %37 = vector.load %arg8[%c0_24, %c0_25] : memref<128x128xf32, #tpu.memory_space<vmem>>, vector<128x128xf32>
    %cst_26 = arith.constant dense<0.000000e+00> : vector<8x128xf32>
    %38 = tpu.matmul %36, %37, %cst_26 {dimension_numbers = #tpu.dot_dimension_numbers<[1], [0], [0], [1], [0, 0, 1, 1], [], []>} : vector<8x128xf32>, vector<128x128xf32>, vector<8x128xf32> -> vector<8x128xf32>
    %c0_27 = arith.constant 0 : index
    %c0_28 = arith.constant 0 : index
    %39 = vector.load %arg9[%c0_27, %c0_28] : memref<1x128xf32, #tpu.memory_space<vmem>>, vector<1x128xf32>
    %40 = vector.broadcast %39 : vector<1x128xf32> to vector<8x128xf32>
    %41 = arith.addf %38, %40 : vector<8x128xf32>
    %cst_29 = arith.constant 5.000000e-01 : f32
    %42 = vector.broadcast %cst_29 : f32 to vector<8x128xf32>
    %43 = arith.mulf %42, %41 : vector<8x128xf32>
    %44 = math.tanh %43 : vector<8x128xf32>
    %cst_30 = arith.constant 5.000000e-01 : f32
    %45 = vector.broadcast %cst_30 : f32 to vector<8x128xf32>
    %46 = arith.mulf %45, %44 : vector<8x128xf32>
    %cst_31 = arith.constant 5.000000e-01 : f32
    %47 = vector.broadcast %cst_31 : f32 to vector<8x128xf32>
    %48 = arith.addf %46, %47 : vector<8x128xf32>
    %c0_32 = arith.constant 0 : index
    %c0_33 = arith.constant 0 : index
    %49 = vector.load %arg10[%c0_32, %c0_33] : memref<128x128xf32, #tpu.memory_space<vmem>>, vector<128x128xf32>
    %cst_34 = arith.constant dense<0.000000e+00> : vector<8x128xf32>
    %50 = tpu.matmul %48, %49, %cst_34 {dimension_numbers = #tpu.dot_dimension_numbers<[1], [0], [0], [1], [0, 0, 1, 1], [], []>} : vector<8x128xf32>, vector<128x128xf32>, vector<8x128xf32> -> vector<8x128xf32>
    %c0_35 = arith.constant 0 : index
    %c0_36 = arith.constant 0 : index
    %51 = vector.load %arg11[%c0_35, %c0_36] : memref<1x128xf32, #tpu.memory_space<vmem>>, vector<1x128xf32>
    %52 = vector.broadcast %51 : vector<1x128xf32> to vector<8x128xf32>
    %53 = arith.addf %50, %52 : vector<8x128xf32>
    %c0_37 = arith.constant 0 : index
    %c0_38 = arith.constant 0 : index
    %54 = vector.load %arg12[%c0_37, %c0_38] : memref<8x128xf32, #tpu.memory_space<vmem>>, vector<8x128xf32>
    tpu.vector_store %arg12[%c0_37, %c0_38], %53 {strides = array<i32>} : memref<8x128xf32, #tpu.memory_space<vmem>>, vector<8x128xf32>,
    return
  }
  func.func @transform_0(%arg0: i32) -> (i32, i32) {
    %c0_i32 = arith.constant 0 : i32
    %c0_i32_0 = arith.constant 0 : i32
    return %arg0, %c0_i32 : i32, i32
  }
  func.func @transform_1(%arg0: i32) -> (i32, i32) {
    %c0_i32 = arith.constant 0 : i32
    %c0_i32_0 = arith.constant 0 : i32
    %c0_i32_1 = arith.constant 0 : i32
    return %c0_i32, %c0_i32_0 : i32, i32
  }
  func.func @transform_2(%arg0: i32) -> (i32, i32) {
    %c0_i32 = arith.constant 0 : i32
    %c0_i32_0 = arith.constant 0 : i32
    %c0_i32_1 = arith.constant 0 : i32
    return %c0_i32, %c0_i32_0 : i32, i32
  }
  func.func @transform_3(%arg0: i32) -> (i32, i32) {
    %c0_i32 = arith.constant 0 : i32
    %c0_i32_0 = arith.constant 0 : i32
    %c0_i32_1 = arith.constant 0 : i32
    return %c0_i32, %c0_i32_0 : i32, i32
  }
  func.func @transform_4(%arg0: i32) -> (i32, i32) {
    %c0_i32 = arith.constant 0 : i32
    %c0_i32_0 = arith.constant 0 : i32
    %c0_i32_1 = arith.constant 0 : i32
    return %c0_i32, %c0_i32_0 : i32, i32
  }
  func.func @transform_5(%arg0: i32) -> (i32, i32) {
    %c0_i32 = arith.constant 0 : i32
    %c0_i32_0 = arith.constant 0 : i32
    %c0_i32_1 = arith.constant 0 : i32
    return %c0_i32, %c0_i32_0 : i32, i32
  }
  func.func @transform_6(%arg0: i32) -> (i32, i32) {
    %c0_i32 = arith.constant 0 : i32
    %c0_i32_0 = arith.constant 0 : i32
    %c0_i32_1 = arith.constant 0 : i32
    return %c0_i32, %c0_i32_0 : i32, i32
  }
  func.func @transform_7(%arg0: i32) -> (i32, i32) {
    %c0_i32 = arith.constant 0 : i32
    %c0_i32_0 = arith.constant 0 : i32
    %c0_i32_1 = arith.constant 0 : i32
    return %c0_i32, %c0_i32_0 : i32, i32
  }
  func.func @transform_8(%arg0: i32) -> (i32, i32) {
    %c0_i32 = arith.constant 0 : i32
    %c0_i32_0 = arith.constant 0 : i32
    %c0_i32_1 = arith.constant 0 : i32
    return %c0_i32, %c0_i32_0 : i32, i32
  }
  func.func @transform_9(%arg0: i32) -> (i32, i32) {
    %c0_i32 = arith.constant 0 : i32
    %c0_i32_0 = arith.constant 0 : i32
    %c0_i32_1 = arith.constant 0 : i32
    return %c0_i32, %c0_i32_0 : i32, i32
  }
  func.func @transform_10(%arg0: i32) -> (i32, i32) {
    %c0_i32 = arith.constant 0 : i32
    %c0_i32_0 = arith.constant 0 : i32
    %c0_i32_1 = arith.constant 0 : i32
    return %c0_i32, %c0_i32_0 : i32, i32
  }
  func.func @transform_11(%arg0: i32) -> (i32, i32) {
    %c0_i32 = arith.constant 0 : i32
    %c0_i32_0 = arith.constant 0 : i32
    return %arg0, %c0_i32 : i32, i32
  }
}

</mosaic_0001>

<bundles_post_ra>
// kernel: dnn_forward.1
= control target key start
LH: loop header
LB: loop body
LE: loop exit
PB: predicated region body
PF: predicated region fallthrough
CT: control target
= control target key end

     0   :  { %v957_v3 = vmov 0.0|0.0   ;;  %vm958_vm0 = vmmov 0   ;;  %v959_v6 = vmov 0.0   ;;  %s1341_s0 = inlined_call_operand.vmem [shape: f32[8,128], index: 0, kind: input, shape index: {}]   ;;  %s1342_s1 = inlined_call_operand.vmem [shape: f32[128,128], index: 1, kind: input, shape index: {}]   ;;  %s1343_s2 = inlined_call_operand.vmem [shape: f32[1,128], index: 2, kind: input, shape index: {}]   ;;  %s1344_s3 = inlined_call_operand.vmem [shape: f32[128,128], index: 3, kind: input, shape index: {}]   ;;  %s1345_s4 = inlined_call_operand.vmem [shape: f32[1,128], index: 4, kind: input, shape index: {}]   ;;  %s1346_s5 = inlined_call_operand.vmem [shape: f32[128,128], index: 5, kind: input, shape index: {}]   ;;  %s1347_s6 = inlined_call_operand.vmem [shape: f32[1,128], index: 6, kind: input, shape index: {}]   ;;  %s1348_s7 = inlined_call_operand.vmem [shape: f32[128,128], index: 7, kind: input, shape index: {}]   ;;  %s1349_s8 = inlined_call_operand.vmem [shape: f32[1,128], index: 8, kind: input, shape index: {}]   ;;  %s1350_s9 = inlined_call_operand.vmem [shape: f32[128,128], index: 9, kind: input, shape index: {}]   ;;  %s1351_s10 = inlined_call_operand.vmem [shape: f32[1,128], index: 10, kind: input, shape index: {}]   ;;  %s1352_s11 = inlined_call_operand.hbm [shape: f32[8,128], index: 11, kind: output, shape index: {}]  }
   0x1   :  { %v40_v0 = vld [vmem:[%s1342_s1] sm:$0xff]  ;;  %v41_v1 = vld [vmem:[%s1342_s1 + $0x8] sm:$0xff]  ;;  %v42_v2 = vld [vmem:[%s1342_s1 + $0x10] sm:$0xff]  ;;  %801 = vmatprep.subr.bf16.mxu0 %v957_v3  ;;  %658 = vmatprep.mubr.msk.f32.mxu0 %vm958_vm0, %v959_v6 }
   0x2   :  { %v802_v4 = vpack.c.bf16 %v41_v1, %v40_v0  ;;  %v43_v5 = vld [vmem:[%s1342_s1 + $0x18] sm:$0xff]  ;;  %825 = vmatprep.subr.bf16.mxu1 %v957_v3  ;;  %693 = vmatprep.mubr.msk.f32.mxu1 %vm958_vm0, %v959_v6  ;;  %v44_v8 = vld [vmem:[%s1342_s1 + $0x20] sm:$0xff]  ;;  %v45_v9 = vld [vmem:[%s1342_s1 + $0x28] sm:$0xff] }
   0x3   :  { %v805_v7 = vpack.c.bf16 %v43_v5, %v42_v2  ;;  %v137_v10 = vld [vmem:[%s1344_s3] sm:$0xff]  ;;  %v138_v11 = vld [vmem:[%s1344_s3 + $0x8] sm:$0xff]  ;;  %v139_v12 = vld [vmem:[%s1344_s3 + $0x10] sm:$0xff]  ;;  %v808_v14 = vpack.c.bf16 %v45_v9, %v44_v8 }
   0x4   :  { %803 = vmatpush3.bf16.msra.mxu0 %v802_v4  ;;  %v140_v13 = vld [vmem:[%s1344_s3 + $0x18] sm:$0xff]  ;;  %v826_v15 = vpack.c.bf16 %v138_v11, %v137_v10  ;;  %v46_v16 = vld [vmem:[%s1342_s1 + $0x30] sm:$0xff] }
   0x5   :  { %804 = vmatprep.subr.bf16.mxu0 %v957_v3  ;;  %v47_v17 = vld [vmem:[%s1342_s1 + $0x38] sm:$0xff] }
   0x8   :  { %806 = vmatpush3.bf16.msra.mxu0 %v805_v7 }
   0x9   :  { %807 = vmatprep.subr.bf16.mxu0 %v957_v3 }
   0xa   :  { %16 = vsyncpa [#allocation3], 0  ;;  %827 = vmatpush3.bf16.msra.mxu1 %v826_v15  ;;  %v829_v18 = vpack.c.bf16 %v140_v13, %v139_v12  ;;  %v141_v19 = vld [vmem:[%s1344_s3 + $0x20] sm:$0xff]  ;;  %v142_v20 = vld [vmem:[%s1344_s3 + $0x28] sm:$0xff]  ;;  %v811_v21 = vpack.c.bf16 %v47_v17, %v46_v16 }
   0xb   :  { %828 = vmatprep.subr.bf16.mxu1 %v957_v3  ;;  %v48_v22 = vld [vmem:[%s1342_s1 + $0x40] sm:$0xff]  ;;  %v49_v23 = vld [vmem:[%s1342_s1 + $0x48] sm:$0xff]  ;;  %v832_v24 = vpack.c.bf16 %v142_v20, %v141_v19  ;;  %v50_v26 = vld [vmem:[%s1342_s1 + $0x50] sm:$0xff] }
   0xc   :  { %809 = vmatpush3.bf16.msra.mxu0 %v808_v14  ;;  %v814_v25 = vpack.c.bf16 %v49_v23, %v48_v22  ;;  %v51_v27 = vld [vmem:[%s1342_s1 + $0x58] sm:$0xff]  ;;  %v52_v29 = vld [vmem:[%s1342_s1 + $0x60] sm:$0xff]  ;;  %v53_v30 = vld [vmem:[%s1342_s1 + $0x68] sm:$0xff] }
   0xd   :  { %810 = vmatprep.subr.bf16.mxu0 %v957_v3  ;;  %v817_v28 = vpack.c.bf16 %v51_v27, %v50_v26  ;;  %v820_v31 = vpack.c.bf16 %v53_v30, %v52_v29  ;;  %v54_v32 = vld [vmem:[%s1342_s1 + $0x70] sm:$0xff]  ;;  %v55_v33 = vld [vmem:[%s1342_s1 + $0x78] sm:$0xff]  ;;  %v39_v35 = vld [vmem:[%s1341_s0] sm:$0xff] }
   0xe   :  { %830 = vmatpush3.bf16.msra.mxu1 %v829_v18  ;;  %v823_v34 = vpack.c.bf16 %v55_v33, %v54_v32  ;;  %v143_v36 = vld [vmem:[%s1344_s3 + $0x30] sm:$0xff]  ;;  %v144_v37 = vld [vmem:[%s1344_s3 + $0x38] sm:$0xff]  ;;  %v145_v39 = vld [vmem:[%s1344_s3 + $0x40] sm:$0xff] }
   0xf   :  { %831 = vmatprep.subr.bf16.mxu1 %v957_v3  ;;  %v835_v38 = vpack.c.bf16 %v144_v37, %v143_v36  ;;  %v146_v40 = vld [vmem:[%s1344_s3 + $0x48] sm:$0xff]  ;;  %v147_v42 = vld [vmem:[%s1344_s3 + $0x50] sm:$0xff]  ;;  %v148_v43 = vld [vmem:[%s1344_s3 + $0x58] sm:$0xff] }
  0x10   :  { %812 = vmatpush3.bf16.msra.mxu0 %v811_v21  ;;  %v838_v41 = vpack.c.bf16 %v146_v40, %v145_v39  ;;  %v841_v44 = vpack.c.bf16 %v148_v43, %v147_v42  ;;  %v149_v45 = vld [vmem:[%s1344_s3 + $0x60] sm:$0xff]  ;;  %v150_v46 = vld [vmem:[%s1344_s3 + $0x68] sm:$0xff]  ;;  %v151_v48 = vld [vmem:[%s1344_s3 + $0x70] sm:$0xff] }
  0x11   :  { %813 = vmatprep.subr.bf16.mxu0 %v957_v3  ;;  %v844_v47 = vpack.c.bf16 %v150_v46, %v149_v45  ;;  %v152_v49 = vld [vmem:[%s1344_s3 + $0x78] sm:$0xff]  ;;  %v234_v51 = vld [vmem:[%s1346_s5] sm:$0xff]  ;;  %v235_v52 = vld [vmem:[%s1346_s5 + $0x8] sm:$0xff] }
  0x12   :  { %833 = vmatpush3.bf16.msra.mxu1 %v832_v24  ;;  %v847_v50 = vpack.c.bf16 %v152_v49, %v151_v48  ;;  %v236_v53 = vld [vmem:[%s1346_s5 + $0x10] sm:$0xff]  ;;  %v850_v54 = vpack.c.bf16 %v235_v52, %v234_v51  ;;  %v237_v55 = vld [vmem:[%s1346_s5 + $0x18] sm:$0xff]  ;;  %v238_v57 = vld [vmem:[%s1346_s5 + $0x20] sm:$0xff] }
  0x13   :  { %834 = vmatprep.subr.bf16.mxu1 %v957_v3  ;;  %v853_v56 = vpack.c.bf16 %v237_v55, %v236_v53  ;;  %v239_v58 = vld [vmem:[%s1346_s5 + $0x28] sm:$0xff]  ;;  %v536_v60 = vld [vmem:[%s1343_s2] ss:$0 sm:$0xff]  ;;  %v240_v5 = vld [vmem:[%s1346_s5 + $0x30] sm:$0xff] }
  0x14   :  { %815 = vmatpush3.bf16.msra.mxu0 %v814_v25  ;;  %v856_v59 = vpack.c.bf16 %v239_v58, %v238_v57  ;;  %v241_v7 = vld [vmem:[%s1346_s5 + $0x38] sm:$0xff]  ;;  %v242_v9 = vld [vmem:[%s1346_s5 + $0x40] sm:$0xff]  ;;  %v243_v10 = vld [vmem:[%s1346_s5 + $0x48] sm:$0xff] }
  0x15   :  { %816 = vmatprep.subr.bf16.mxu0 %v957_v3  ;;  %v859_v8 = vpack.c.bf16 %v241_v7, %v240_v5  ;;  %v862_v11 = vpack.c.bf16 %v243_v10, %v242_v9  ;;  %v244_v12 = vld [vmem:[%s1346_s5 + $0x50] sm:$0xff]  ;;  %v245_v13 = vld [vmem:[%s1346_s5 + $0x58] sm:$0xff]  ;;  %v246_v15 = vld [vmem:[%s1346_s5 + $0x60] sm:$0xff] }
  0x16   :  { %836 = vmatpush3.bf16.msra.mxu1 %v835_v38  ;;  %v865_v14 = vpack.c.bf16 %v245_v13, %v244_v12  ;;  %v247_v16 = vld [vmem:[%s1346_s5 + $0x68] sm:$0xff]  ;;  %v248_v18 = vld [vmem:[%s1346_s5 + $0x70] sm:$0xff]  ;;  %v249_v19 = vld [vmem:[%s1346_s5 + $0x78] sm:$0xff] }
  0x17   :  { %837 = vmatprep.subr.bf16.mxu1 %v957_v3  ;;  %v868_v17 = vpack.c.bf16 %v247_v16, %v246_v15  ;;  %v871_v20 = vpack.c.bf16 %v249_v19, %v248_v18  ;;  %v331_v21 = vld [vmem:[%s1348_s7] sm:$0xff]  ;;  %v332_v22 = vld [vmem:[%s1348_s7 + $0x8] sm:$0xff]  ;;  %v333_v23 = vld [vmem:[%s1348_s7 + $0x10] sm:$0xff] }
  0x18   :  { %818 = vmatpush3.bf16.msra.mxu0 %v817_v28  ;;  %v874_v24 = vpack.c.bf16 %v332_v22, %v331_v21  ;;  %v334_v25 = vld [vmem:[%s1348_s7 + $0x18] sm:$0xff]  ;;  %v335_v27 = vld [vmem:[%s1348_s7 + $0x20] sm:$0xff]  ;;  %v336_v28 = vld [vmem:[%s1348_s7 + $0x28] sm:$0xff] }
  0x19   :  { %819 = vmatprep.subr.bf16.mxu0 %v957_v3  ;;  %v877_v26 = vpack.c.bf16 %v334_v25, %v333_v23  ;;  %v880_v29 = vpack.c.bf16 %v336_v28, %v335_v27  ;;  %v537_v30 = vld [vmem:[%s1345_s4] ss:$0 sm:$0xff]  ;;  %v337_v38 = vld [vmem:[%s1348_s7 + $0x30] sm:$0xff]  ;;  %v338_v39 = vld [vmem:[%s1348_s7 + $0x38] sm:$0xff] }
  0x1a   :  { %839 = vmatpush3.bf16.msra.mxu1 %v838_v41  ;;  %v883_v40 = vpack.c.bf16 %v338_v39, %v337_v38  ;;  %v339_v41 = vld [vmem:[%s1348_s7 + $0x40] sm:$0xff]  ;;  %v341_v43 = vld [vmem:[%s1348_s7 + $0x50] sm:$0xff]  ;;  %v429_v53 = vld [vmem:[%s1350_s9 + $0x8] sm:$0xff] }
  0x1b   :  { %840 = vmatprep.subr.bf16.mxu1 %v957_v3  ;;  %v343_v46 = vld [vmem:[%s1348_s7 + $0x60] sm:$0xff]  ;;  %v345_v49 = vld [vmem:[%s1348_s7 + $0x70] sm:$0xff] }
  0x1c   :  { %821 = vmatpush3.bf16.msra.mxu0 %v820_v31  ;;  %v428_v52 = vld [vmem:[%s1350_s9] sm:$0xff]  ;;  %v434_v7 = vld [vmem:[%s1350_s9 + $0x30] sm:$0xff] }
  0x1d   :  { %822 = vmatprep.subr.bf16.mxu0 %v957_v3  ;;  %v898_v55 = vpack.c.bf16 %v429_v53, %v428_v52  ;;  %v432_v58 = vld [vmem:[%s1350_s9 + $0x20] sm:$0xff]  ;;  %v438_v13 = vld [vmem:[%s1350_s9 + $0x50] sm:$0xff] }
  0x1e   :  { %842 = vmatpush3.bf16.msra.mxu1 %v841_v44  ;;  %v342_v44 = vld [vmem:[%s1348_s7 + $0x58] sm:$0xff]  ;;  %v436_v10 = vld [vmem:[%s1350_s9 + $0x40] sm:$0xff]  ;;  %v442_v19 = vld [vmem:[%s1350_s9 + $0x70] sm:$0xff] }
  0x1f   :  { %843 = vmatprep.subr.bf16.mxu1 %v957_v3  ;;  %v889_v45 = vpack.c.bf16 %v342_v44, %v341_v43  ;;  %v440_v16 = vld [vmem:[%s1350_s9 + $0x60] sm:$0xff] }
  0x20   :  { %824 = vmatpush3.bf16.msra.mxu0 %v823_v34  ;;  %v539_v22 = vld [vmem:[%s1349_s8] ss:$0 sm:$0xff] }
  0x21   :  { %849 = vmatprep.subr.bf16.mxu0 %v957_v3 }
  0x22   :  { %845 = vmatpush3.bf16.msra.mxu1 %v844_v47  ;;  %v344_v47 = vld [vmem:[%s1348_s7 + $0x68] sm:$0xff] }
  0x23   :  { %659 = vmatmul.mubr.f32.vlgmr.msra.gmra.mrb[0].mxu0 %v39_v35  ;;  %846 = vmatprep.subr.bf16.mxu1 %v957_v3  ;;  %v892_v48 = vpack.c.bf16 %v344_v47, %v343_v46 }
  0x24   :  { %728 = vmatprep.mubr.msk.f32.mxu0 %vm958_vm0, %v959_v6  ;;  %851 = vmatpush3.bf16.msra.mxu0 %v850_v54  ;;  %v430_v54 = vld [vmem:[%s1350_s9 + $0x10] sm:$0xff] }
  0x25   :  { %852 = vmatprep.subr.bf16.mxu0 %v957_v3 }
  0x26   :  { %848 = vmatpush3.bf16.msra.mxu1 %v847_v50  ;;  %v346_v50 = vld [vmem:[%s1348_s7 + $0x78] sm:$0xff] }
  0x27   :  { %873 = vmatprep.subr.bf16.mxu1 %v957_v3  ;;  %v895_v51 = vpack.c.bf16 %v346_v50, %v345_v49 }
  0x28   :  { %854 = vmatpush3.bf16.msra.mxu0 %v853_v56  ;;  %v431_v56 = vld [vmem:[%s1350_s9 + $0x18] sm:$0xff] }
  0x29   :  { %855 = vmatprep.subr.bf16.mxu0 %v957_v3  ;;  %v901_v57 = vpack.c.bf16 %v431_v56, %v430_v54 }
  0x2c   :  { %857 = vmatpush3.bf16.msra.mxu0 %v856_v59  ;;  %v433_v59 = vld [vmem:[%s1350_s9 + $0x28] sm:$0xff] }
  0x2d   :  { %858 = vmatprep.subr.bf16.mxu0 %v957_v3 }
  0x30   :  { %860 = vmatpush3.bf16.msra.mxu0 %v859_v8  ;;  %v435_v8 = vld [vmem:[%s1350_s9 + $0x38] sm:$0xff] }
  0x31   :  { %861 = vmatprep.subr.bf16.mxu0 %v957_v3  ;;  %v907_v9 = vpack.c.bf16 %v435_v8, %v434_v7 }
  0x34   :  { %863 = vmatpush3.bf16.msra.mxu0 %v862_v11  ;;  %v437_v11 = vld [vmem:[%s1350_s9 + $0x48] sm:$0xff] }
  0x35   :  { %864 = vmatprep.subr.bf16.mxu0 %v957_v3  ;;  %v910_v12 = vpack.c.bf16 %v437_v11, %v436_v10 }
  0x38   :  { %866 = vmatpush3.bf16.msra.mxu0 %v865_v14  ;;  %v439_v14 = vld [vmem:[%s1350_s9 + $0x58] sm:$0xff] }
  0x39   :  { %867 = vmatprep.subr.bf16.mxu0 %v957_v3  ;;  %v913_v15 = vpack.c.bf16 %v439_v14, %v438_v13 }
  0x3c   :  { %869 = vmatpush3.bf16.msra.mxu0 %v868_v17  ;;  %v441_v17 = vld [vmem:[%s1350_s9 + $0x68] sm:$0xff] }
  0x3d   :  { %870 = vmatprep.subr.bf16.mxu0 %v957_v3  ;;  %v916_v18 = vpack.c.bf16 %v441_v17, %v440_v16 }
  0x40   :  { %872 = vmatpush3.bf16.msra.mxu0 %v871_v20  ;;  %v443_v20 = vld [vmem:[%s1350_s9 + $0x78] sm:$0xff]  ;;  %s960_s9 = smov [#allocation2]  }
  0x41   :  { %897 = vmatprep.subr.bf16.mxu0 %v957_v3  ;;  %v919_v21 = vpack.c.bf16 %v443_v20, %v442_v19  ;;  %s528_s28 = sshll.u32 %s960_s9, 4  ;;  %s529_s28 = int_to_ptr.vmem [resolvable:$true] %s528_s28 }
  0x42   :  { %s933_s8 = scalar_lea.vmem %s529_s28, 128  ;;  %p938_p1 = scmp.lt.s32.totalorder %s529_s28, %s529_s28 }
  0x43   :  { %p934_p0 = scmp.ne.s32.totalorder %s529_s28, %s933_s8  ;;  %p939_p2 = scmp.lt.s32.totalorder %s933_s8, %s933_s8 }
  0x45   :  { %p940_p3 = por %p939_p2, %p938_p1 }
  0x47   :  { %p941_p4 = pnand %p940_p3, %p934_p0 }
  0xf6   :  { %v129_v61 = vpop.f32.mrb[0].mxu0 }
  0xf7   :  { %v130_v62 = vadd.f32 %v536_v60, %v129_v61  ;;  %v660_v63 = vpop.f32.mrb[1].mxu0  ;;  %v904_v60 = vpack.c.bf16 %v433_v59, %v432_v58  ;;  %v538_v61 = vld [vmem:[%s1347_s6] ss:$0 sm:$0xff] }
  0xf9   :  { %v133_v0 = vmul.f32 0.5, %v130_v62 }
  0xfb   :  { %925 = vtanh.f32 %v133_v0 }
 0x105   :  { %v926_v1 = vpop.eup %925 }
 0x106   :  { %v135_v2 = vmul.f32 0.5, %v926_v1 }
 0x108   :  { %v136_v4 = vadd.f32 0.5, %v135_v2 }
 0x10a   :  { %694 = vmatmul.mubr.f32.vlgmr.msra.gmra.mrb[0].mxu1 %v136_v4 }
 0x10b   :  { %763 = vmatprep.mubr.msk.f32.mxu1 %vm958_vm0, %v959_v6  ;;  %875 = vmatpush3.bf16.msra.mxu1 %v874_v24 }
 0x10c   :  { %876 = vmatprep.subr.bf16.mxu1 %v957_v3 }
 0x10f   :  { %878 = vmatpush3.bf16.msra.mxu1 %v877_v26 }
 0x110   :  { %879 = vmatprep.subr.bf16.mxu1 %v957_v3 }
 0x113   :  { %881 = vmatpush3.bf16.msra.mxu1 %v880_v29  ;;  %v540_v29 = vld [vmem:[%s1351_s10] ss:$0 sm:$0xff] }
 0x114   :  { %882 = vmatprep.subr.bf16.mxu1 %v957_v3 }
 0x117   :  { %884 = vmatpush3.bf16.msra.mxu1 %v883_v40 }
 0x118   :  { %885 = vmatprep.subr.bf16.mxu1 %v957_v3 }
 0x1dd   :  { %v226_v31 = vpop.f32.mrb[0].mxu1 }
 0x1de   :  { %v227_v32 = vadd.f32 %v537_v30, %v226_v31  ;;  %v695_v33 = vpop.f32.mrb[1].mxu1 }
 0x1e0   :  { %v230_v34 = vmul.f32 0.5, %v227_v32 }
 0x1e2   :  { %927 = vtanh.f32 %v230_v34 }
 0x1ec   :  { %v928_v35 = vpop.eup %927 }
 0x1ed   :  { %v232_v36 = vmul.f32 0.5, %v928_v35 }
 0x1ef   :  { %v233_v37 = vadd.f32 0.5, %v232_v36 }
 0x1f1   :  { %729 = vmatmul.mubr.f32.vlgmr.msra.gmra.mrb[2].mxu0 %v233_v37 }
 0x1f2   :  { %798 = vmatprep.mubr.msk.f32.mxu0 %vm958_vm0, %v959_v6  ;;  %v340_v6 = vld [vmem:[%s1348_s7 + $0x48] sm:$0xff]  ;;  %899 = vmatpush3.bf16.msra.mxu0 %v898_v55 }
 0x1f3   :  { %v886_v42 = vpack.c.bf16 %v340_v6, %v339_v41  ;;  %900 = vmatprep.subr.bf16.mxu0 %v957_v3 }
 0x1f5   :  { %887 = vmatpush3.bf16.msra.mxu1 %v886_v42 }
 0x1f6   :  { %888 = vmatprep.subr.bf16.mxu1 %v957_v3  ;;  %902 = vmatpush3.bf16.msra.mxu0 %v901_v57 }
 0x1f7   :  { %903 = vmatprep.subr.bf16.mxu0 %v957_v3 }
 0x1f9   :  { %890 = vmatpush3.bf16.msra.mxu1 %v889_v45 }
 0x1fa   :  { %891 = vmatprep.subr.bf16.mxu1 %v957_v3  ;;  %905 = vmatpush3.bf16.msra.mxu0 %v904_v60 }
 0x1fb   :  { %906 = vmatprep.subr.bf16.mxu0 %v957_v3 }
 0x1fd   :  { %893 = vmatpush3.bf16.msra.mxu1 %v892_v48 }
 0x1fe   :  { %894 = vmatprep.subr.bf16.mxu1 %v957_v3  ;;  %908 = vmatpush3.bf16.msra.mxu0 %v907_v9 }
 0x1ff   :  { %909 = vmatprep.subr.bf16.mxu0 %v957_v3 }
 0x201   :  { %896 = vmatpush3.bf16.msra.mxu1 %v895_v51 }
 0x202   :  { %911 = vmatpush3.bf16.msra.mxu0 %v910_v12 }
 0x203   :  { %912 = vmatprep.subr.bf16.mxu0 %v957_v3 }
 0x206   :  { %914 = vmatpush3.bf16.msra.mxu0 %v913_v15 }
 0x207   :  { %915 = vmatprep.subr.bf16.mxu0 %v957_v3 }
 0x20a   :  { %917 = vmatpush3.bf16.msra.mxu0 %v916_v18 }
 0x20b   :  { %918 = vmatprep.subr.bf16.mxu0 %v957_v3 }
 0x20e   :  { %920 = vmatpush3.bf16.msra.mxu0 %v919_v21 }
 0x2c4   :  { %v323_v62 = vpop.f32.mrb[2].mxu0 }
 0x2c5   :  { %v324_v63 = vadd.f32 %v538_v61, %v323_v62  ;;  %v730_v0 = vpop.f32.mrb[3].mxu0 }
 0x2c7   :  { %v327_v1 = vmul.f32 0.5, %v324_v63 }
 0x2c9   :  { %929 = vtanh.f32 %v327_v1 }
 0x2d3   :  { %v930_v2 = vpop.eup %929 }
 0x2d4   :  { %v329_v4 = vmul.f32 0.5, %v930_v2 }
 0x2d6   :  { %v330_v5 = vadd.f32 0.5, %v329_v4 }
 0x2d8   :  { %764 = vmatmul.mubr.f32.vlgmr.msra.gmra.mrb[2].mxu1 %v330_v5 }
 0x3ab   :  { %v420_v23 = vpop.f32.mrb[2].mxu1 }
 0x3ac   :  { %v421_v24 = vadd.f32 %v539_v22, %v420_v23  ;;  %v765_v25 = vpop.f32.mrb[3].mxu1 }
 0x3ae   :  { %v424_v26 = vmul.f32 0.5, %v421_v24 }
 0x3b0   :  { %931 = vtanh.f32 %v424_v26 }
 0x3ba   :  { %v932_v3 = vpop.eup %931 }
 0x3bb   :  { %v426_v27 = vmul.f32 0.5, %v932_v3 }
 0x3bd   :  { %v427_v28 = vadd.f32 0.5, %v426_v27 }
 0x3bf   :  { %799 = vmatmul.mubr.f32.vlgmr.msra.gmra.mrb[4].mxu0 %v427_v28 }
 0x492   :  { %v517_v30 = vpop.f32.mrb[4].mxu0 }
 0x493   :  { %v518_v31 = vadd.f32 %v540_v29, %v517_v30  ;;  %v800_v32 = vpop.f32.mrb[5].mxu0 }
 0x495   :  { %521 = vst [vmem:[#allocation2] sm:$0xff] %v518_v31 }
 0x496   :  { %944 = shalt.err (!%p941_p4)
}
 0x497   :  { %s945_s3 = scalar_lea.hbm %s1352_s11, 128 }
 0x498   :  { %p946_p5 = scmp.ne.s32.totalorder %s1352_s11, %s945_s3  ;;  %p949_p6 = scmp.lt.u32.totalorder %s945_s3, %s1352_s11 }
 0x49a   :  { %p951_p7 = pnand %p949_p6, %p946_p5 }
 0x49c   :  { %954 = shalt.err (!%p951_p7)
}
 0x49d   :  { %531 = dma.vmem_to_hbm [thread:$0]  %s529_s28, 128, %s1352_s11, [#allocation3]  }
 0x49e   :  { %955 = dma.done.wait [#allocation3], 128  }
 0x49f   :  { %956 = vsyncadd [#allocation3], 4294967168 }
 0x4a0   :  { %535 = vsyncpa [#allocation3], 1 }

</bundles_post_ra>
